<compile_context>
chip_gen: v5e
topology: v5e:2x2
jax: 0.10.0
libtpu: 0.0.40
codegen_flags: <defaults>
</compile_context>

<pallas_src>
import jax
import jax.numpy as jnp
from jax import lax
from jax.experimental import pallas as pl
from jax.experimental.pallas import tpu as pltpu
import math


def _attend(p, s, w, out_dtype):
    """Shared fused body: everything already resident in VMEM.

    Elementwise / reduction work stays in f32 (v5e VPU/EUP have no bf16).
    """
    h_i = jnp.dot(p, w, preferred_element_type=jnp.float32)          # (N, out)
    h_j = jnp.dot(s, w, preferred_element_type=jnp.float32)          # (M, out)

    # h_i @ h_j^T without a materialized transpose: contract dim 1 of both.
    sig = lax.dot_general(
        h_i, h_j, (((1,), (1,)), ((), ())),
        preferred_element_type=jnp.float32)                          # (N, M)
    a_ij = jnp.maximum(sig, 0.0)                                     # relu

    # Final MXU op on the un-normalized scores; the global Frobenius
    # reduction + rsqrt run on XLU/EUP in parallel, scale applied after.
    c_raw = jnp.dot(a_ij, s.astype(jnp.float32),
                    preferred_element_type=jnp.float32)              # (N, F)

    # If relu zeroes every score this yields NaN (0 * inf), exactly like the
    # PyTorch reference (matrix_norm == 0).
    inv_fro = lax.rsqrt(jnp.sum(a_ij * a_ij))
    return (c_raw * inv_fro).astype(out_dtype)


def _attention_kernel(p_ref, s_ref, w_ref, o_ref):
    o_ref[...] = _attend(p_ref[...], s_ref[...], w_ref[...], o_ref.dtype)


def _attention_kernel_batched(p_ref, s_ref, w_ref, o_ref):
    # p_ref/s_ref/o_ref blocks are (1, ., .); weight block is the full array
    # and its block index never changes, so it is DMA'd into VMEM once.
    o_ref[0] = _attend(p_ref[0], s_ref[0], w_ref[...], o_ref.dtype)


def _vmem_limit_bytes(n, m, f, out_feats, itemsize):
    resident = (n * f + m * f + f * out_feats + n * f) * itemsize    # ins + out
    interm = (n * out_feats + m * out_feats + n * m + n * f) * 4     # f32 temps
    need = 2 * (resident + interm)                                   # headroom
    return int(min(max(need, 16 * 1024 * 1024), 64 * 1024 * 1024))


def attention_layer(feat_p, feat_s, weight_a):
    """Single-problem forward, matching AttentionLayer.forward exactly."""
    n, in_feats = feat_p.shape
    m, in_feats_s = feat_s.shape
    out_feats = weight_a.shape[1]
    assert in_feats_s == in_feats and weight_a.shape[0] == in_feats

    vmem = pltpu.CompilerParams(
        vmem_limit_bytes=_vmem_limit_bytes(
            n, m, in_feats, out_feats, feat_p.dtype.itemsize))

    return pl.pallas_call(
        _attention_kernel,
        out_shape=jax.ShapeDtypeStruct((n, in_feats), feat_p.dtype),
        in_specs=[
            pl.BlockSpec(memory_space=pltpu.MemorySpace.VMEM),
            pl.BlockSpec(memory_space=pltpu.MemorySpace.VMEM),
            pl.BlockSpec(memory_space=pltpu.MemorySpace.VMEM),
        ],
        out_specs=pl.BlockSpec(memory_space=pltpu.MemorySpace.VMEM),
        compiler_params=vmem,
    )(feat_p, feat_s, weight_a)


def attention_layer_batched(feat_p, feat_s, weight_a):
    """Batched forward over B independent (feat_p, feat_s) instances.

    feat_p: (B, N, F), feat_s: (B, M, F) -> (B, N, F).  One grid step per
    problem, 'parallel' semantics (uses both v7x TensorCores; no-op on
    v5e/v6e); amortizes launch overhead over B tiny problems.
    """
    b, n, in_feats = feat_p.shape
    _, m, _ = feat_s.shape
    out_feats = weight_a.shape[1]

    vmem = pltpu.CompilerParams(
        dimension_semantics=("parallel",),
        vmem_limit_bytes=_vmem_limit_bytes(
            n, m, in_feats, out_feats, feat_p.dtype.itemsize))

    return pl.pallas_call(
        _attention_kernel_batched,
        out_shape=jax.ShapeDtypeStruct((b, n, in_feats), feat_p.dtype),
        grid=(b,),
        in_specs=[
            pl.BlockSpec((1, n, in_feats), lambda i: (i, 0, 0)),
            pl.BlockSpec((1, m, in_feats), lambda i: (i, 0, 0)),
            pl.BlockSpec((in_feats, out_feats), lambda i: (0, 0)),
        ],
        out_specs=pl.BlockSpec((1, n, in_feats), lambda i: (i, 0, 0)),
        compiler_params=vmem,
    )(feat_p, feat_s, weight_a)


def attention_layer_ref(feat_p, feat_s, weight_a):
    h_i = feat_p @ weight_a
    h_j = feat_s @ weight_a
    a = jnp.maximum(h_i @ h_j.T, 0.0)
    alpha = a / jnp.sqrt(jnp.sum(a * a))
    return alpha @ feat_s


if __name__ == "__main__":
    key = jax.random.PRNGKey(0)
    kp, ks, kw, kbp, kbs = jax.random.split(key, 5)

    N, M = 8, 8            # number of primary / secondary nodes
    in_feats, out_feats = 32, 32
    B = 4                  # independent problem instances for the batched path

    feat_p = jax.random.normal(kp, (N, in_feats), dtype=jnp.float32)
    feat_s = jax.random.normal(ks, (M, in_feats), dtype=jnp.float32)

    # kaiming_uniform_ (default a=0 -> gain=sqrt(2), fan_in = weight.size(1))
    bound = math.sqrt(2.0) * math.sqrt(3.0 / out_feats)
    weight_a = jax.random.uniform(
        kw, (in_feats, out_feats), dtype=jnp.float32,
        minval=-bound, maxval=bound)

    # --- single-problem path (exact module forward) ---
    out = attention_layer(feat_p, feat_s, weight_a)
    jax.block_until_ready(out)
    ref = attention_layer_ref(feat_p, feat_s, weight_a)
    assert out.shape == (N, in_feats)
    assert jnp.allclose(out, ref, atol=1e-5, rtol=1e-5)

    # --- batched path (B independent problems, 'parallel' grid axis) ---
    bfeat_p = jax.random.normal(kbp, (B, N, in_feats), dtype=jnp.float32)
    bfeat_s = jax.random.normal(kbs, (B, M, in_feats), dtype=jnp.float32)
    bout = attention_layer_batched(bfeat_p, bfeat_s, weight_a)
    jax.block_until_ready(bout)
    assert bout.shape == (B, N, in_feats)
    for i in range(B):
        bref = attention_layer_ref(bfeat_p[i], bfeat_s[i], weight_a)
        assert jnp.allclose(bout[i], bref, atol=1e-5, rtol=1e-5)

    print("KERNEL_OK")
</pallas_src>

<mosaic_0001>
module attributes {stable_mosaic.version = 11 : i64} {
  func.func @_attention_kernel(%arg0: memref<8x32xf32, #tpu.memory_space<vmem>>, %arg1: memref<8x32xf32, #tpu.memory_space<vmem>>, %arg2: memref<32x32xf32, #tpu.memory_space<vmem>>, %arg3: memref<8x32xf32, #tpu.memory_space<vmem>>) attributes {dimension_semantics = [], scalar_prefetch = 0 : i64, scratch_operands = 0 : i64, tpu.core_type = #tpu.core_type<tc>} {
    %c0 = arith.constant 0 : index
    %c0_0 = arith.constant 0 : index
    %0 = vector.load %arg0[%c0, %c0_0] : memref<8x32xf32, #tpu.memory_space<vmem>>, vector<8x32xf32>
    %c0_1 = arith.constant 0 : index
    %c0_2 = arith.constant 0 : index
    %1 = vector.load %arg1[%c0_1, %c0_2] : memref<8x32xf32, #tpu.memory_space<vmem>>, vector<8x32xf32>
    %c0_3 = arith.constant 0 : index
    %c0_4 = arith.constant 0 : index
    %2 = vector.load %arg2[%c0_3, %c0_4] : memref<32x32xf32, #tpu.memory_space<vmem>>, vector<32x32xf32>
    %cst = arith.constant dense<0.000000e+00> : vector<8x32xf32>
    %3 = tpu.matmul %0, %2, %cst {dimension_numbers = #tpu.dot_dimension_numbers<[1], [0], [0], [1], [0, 0, 1, 1], [], []>} : vector<8x32xf32>, vector<32x32xf32>, vector<8x32xf32> -> vector<8x32xf32>
    %cst_5 = arith.constant dense<0.000000e+00> : vector<8x32xf32>
    %4 = tpu.matmul %1, %2, %cst_5 {dimension_numbers = #tpu.dot_dimension_numbers<[1], [0], [0], [1], [0, 0, 1, 1], [], []>} : vector<8x32xf32>, vector<32x32xf32>, vector<8x32xf32> -> vector<8x32xf32>
    %cst_6 = arith.constant dense<0.000000e+00> : vector<8x8xf32>
    %5 = tpu.matmul %3, %4, %cst_6 {dimension_numbers = #tpu.dot_dimension_numbers<[1], [1], [0], [0], [0, 0, 1, 0], [], []>} : vector<8x32xf32>, vector<8x32xf32>, vector<8x8xf32> -> vector<8x8xf32>
    %cst_7 = arith.constant 0.000000e+00 : f32
    %6 = vector.broadcast %cst_7 : f32 to vector<8x8xf32>
    %7 = arith.maximumf %5, %6 : vector<8x8xf32>
    %cst_8 = arith.constant dense<0.000000e+00> : vector<8x32xf32>
    %8 = tpu.matmul %7, %1, %cst_8 {dimension_numbers = #tpu.dot_dimension_numbers<[1], [0], [0], [1], [0, 0, 1, 1], [], []>} : vector<8x8xf32>, vector<8x32xf32>, vector<8x32xf32> -> vector<8x32xf32>
    %9 = arith.mulf %7, %7 : vector<8x8xf32>
    %10 = vector.shape_cast %9 : vector<8x8xf32> to vector<1x8x8xf32>
    %cst_9 = arith.constant dense<0.000000e+00> : vector<1xf32>
    %11 = vector.multi_reduction <add>, %10, %cst_9 [1, 2] : vector<1x8x8xf32> to vector<1xf32>
    %12 = vector.shape_cast %11 : vector<1xf32> to vector<1x1x1xf32>
    %13 = vector.extract %12[0, 0, 0] : f32 from vector<1x1x1xf32>
    %14 = math.rsqrt %13 : f32
    %15 = vector.broadcast %14 : f32 to vector<8x32xf32>
    %16 = arith.mulf %8, %15 : vector<8x32xf32>
    %c0_10 = arith.constant 0 : index
    %c0_11 = arith.constant 0 : index
    %17 = vector.load %arg3[%c0_10, %c0_11] : memref<8x32xf32, #tpu.memory_space<vmem>>, vector<8x32xf32>
    tpu.vector_store %arg3[%c0_10, %c0_11], %16 {strides = array<i32>} : memref<8x32xf32, #tpu.memory_space<vmem>>, vector<8x32xf32>,
    return
  }
}

</mosaic_0001>

<bundles_post_ra>
// kernel: tpu_custom_call.1
= control target key start
LH: loop header
LB: loop body
LE: loop exit
PB: predicated region body
PF: predicated region fallthrough
CT: control target
= control target key end

     0   :  { %8 = vsyncpa [#allocation3], 0  ;;  %s368_s0 = inlined_call_operand.hbm [shape: f32[8,32], index: 0, kind: input, shape index: {}]   ;;  %s369_s1 = inlined_call_operand.hbm [shape: f32[8,32], index: 1, kind: input, shape index: {}]   ;;  %s370_s2 = inlined_call_operand.hbm [shape: f32[32,32], index: 2, kind: input, shape index: {}]   ;;  %s371_s3 = inlined_call_operand.hbm [shape: f32[8,32], index: 3, kind: output, shape index: {}]  }
   0x1   :  { %9 = vsyncpa [#allocation6], 0  ;;  %s27_s14 = sshll.u32 %s369_s1, 4  ;;  %s28_s14 = int_to_ptr.hbm [resolvable:$true] %s27_s14 }
   0x2   :  { %10 = vsyncpa [#allocation4], 0  ;;  %s325_s15 = smov [#allocation5]   ;;  %s16_s19 = sshll.u32 %s368_s0, 4  ;;  %s17_s19 = int_to_ptr.hbm [resolvable:$true] %s16_s19 }
   0x3   :  { %s29_s16 = sshll.u32 %s325_s15, 4  ;;  %s326_s20 = smov [#allocation2]   ;;  %s30_s16 = int_to_ptr.vmem [resolvable:$true] %s29_s16 }
   0x4   :  { %32 = dma.hbm_to_vmem [thread:$0]  %s28_s14, 128, %s30_s16, [#allocation6]  }
   0x5   :  { %s18_s21 = sshll.u32 %s326_s20, 4  ;;  %s37_s24 = sshll.u32 %s370_s2, 4  ;;  %s19_s21 = int_to_ptr.vmem [resolvable:$true] %s18_s21  ;;  %s38_s24 = int_to_ptr.hbm [resolvable:$true] %s37_s24 }
   0x6   :  { %21 = dma.hbm_to_vmem [thread:$0]  %s17_s19, 128, %s19_s21, [#allocation3]  }
   0x7   :  { %s327_s1 = smov [#allocation7]   ;;  %s328_s26 = smov 128  }
   0x8   :  { %s39_s25 = sshll.u32 %s327_s1, 4  ;;  %s329_s27 = smov 8   ;;  %s40_s25 = int_to_ptr.vmem [resolvable:$true] %s39_s25 }
   0x9   :  { %45 = dma.hbm_to_vmem [thread:$0]  %s38_s24, 512, %s40_s25, [#allocation6], %s328_s26, %s328_s26, %s329_s27  }
   0xa   :  { %319 = dma.done.wait [#allocation3], 128  }
   0xb   :  { %320 = vsyncadd [#allocation3], 4294967168 }
   0xc   :  { %321 = dma.done.wait [#allocation6], 640  }
   0xd   :  { %322 = vsyncadd [#allocation6], 4294966656  ;;  %v63_v0 = vld [vmem:[#allocation7 + $0x18] sm:$0xff]  ;;  %v62_v1 = vld [vmem:[#allocation7 + $0x10] sm:$0xff]  ;;  %vm64_vm0 = vcmask 261120   ;;  %vm138_vm1 = vcmask 64512  }
   0xe   :  { %103 = vmatpush.msra.mxu1 %v63_v0  ;;  %80 = vmatpush.msra.mxu0 %v63_v0  ;;  %v59_v2 = vld [vmem:[#allocation5] sm:$0xff]  ;;  %v61_v3 = vld [vmem:[#allocation7 + $0x8] sm:$0xff]  ;;  %v60_v4 = vld [vmem:[#allocation7] sm:$0xff]  ;;  %s330_s2 = smov [#allocation8]   ;;  %s195_s4 = sshll.u32 %s371_s3, 4  ;;  %s196_s4 = int_to_ptr.hbm [resolvable:$true] %s195_s4 }
   0xf   :  { %157 = vmatpush.msra.mxu3 %v59_v2  ;;  %v58_v5 = vld [vmem:[#allocation2] sm:$0xff]  ;;  %s193_s28 = sshll.u32 %s330_s2, 4  ;;  %s194_s28 = int_to_ptr.vmem [resolvable:$true] %s193_s28 }
  0x10   :  { %104 = vmatpush.msra.mxu1 %v62_v1  ;;  %81 = vmatpush.msra.mxu0 %v62_v1 }
  0x12   :  { %105 = vmatpush.msra.mxu1 %v61_v3  ;;  %82 = vmatpush.msra.mxu0 %v61_v3 }
  0x14   :  { %106 = vmatpush.msra.mxu1 %v60_v4  ;;  %83 = vmatpush.msra.mxu0 %v60_v4 }
  0x15   :  { %207 = vmatmul.msk.f32.vlgmr.msra.gmra.mxu1 %vm64_vm0, %v59_v2  ;;  %206 = vmatmul.msk.f32.vlgmr.msra.gmra.mxu0 %vm64_vm0, %v58_v5 }
  0x92   :  { %v108_v6 = vpop.f32.mrf.mxu1  ;;  %v85_v7 = vpop.f32.mrf.mxu0 }
  0x93   :  { %208 = vmatpush.xpose.msk.msra.mxu2 %vm64_vm0, %v108_v6 }
  0x96   :  { %209 = vmatmul.msk.f32.vlgmr.msra.gmra.mxu2 %vm64_vm0, %v85_v7 }
 0x119   :  { %v134_v8 = vpop.f32.mrf.mxu2 }
 0x11a   :  { %v137_v9 = vmax.f32 %v134_v8, 0.0 }
 0x11c   :  { %210 = vmatmul.msk.f32.vlgmr.msra.gmra.mxu3 %vm138_vm1, %v137_v9  ;;  %v162_v10 = vmul.f32 %v137_v9, %v137_v9 }
 0x11e   :  { %v163_v11 = vsel %vm138_vm1, %v162_v10, 0.0 }
 0x11f   :  { %164 = vadd.xlane.f32.xlu0 %v163_v11 }
 0x192   :  { %v165_v12 = vpop.xlane.xlu0 %164 }
 0x193   :  { %v166_v13 = vrot.slane %v165_v12, 4 }
 0x195   :  { %v167_v14 = vadd.f32 %v166_v13, %v165_v12 }
 0x197   :  { %v168_v15 = vrot.slane %v167_v14, 2 }
 0x199   :  { %v169_v16 = vadd.f32 %v168_v15, %v167_v14 }
 0x19b   :  { %v170_v17 = vrot.slane %v169_v16, 1 }
 0x19d   :  { %v171_v18 = vadd.f32 %v170_v17, %v169_v16 }
 0x19f   :  { %211 = vpush %v171_v18  ;;  %v159_v27 = vpop.f32.mrf.mxu3 }
 0x1d0   :  { %s212_s0 = spop %211 }
 0x1d1   :  { %v173_v19 = vstv %s212_s0 }
 0x1d2   :  { %221 = vrsqrt.f32 %v173_v19  ;;  %vm180_vm3 = vweird.f32 %v173_v19 }
 0x1d8   :  { %v222_v20 = vpop.eup %221 }
 0x1d9   :  { %v175_v21 = vmul.f32 %v222_v20, %v173_v19  ;;  %vm181_vm2 = vweird.f32 %v222_v20 }
 0x1da   :  { %vm182_vm4 = vmor %vm180_vm3, %vm181_vm2 }
 0x1db   :  { %v176_v22 = vmul.f32 %v222_v20, %v175_v21 }
 0x1dd   :  { %v177_v23 = vmul.f32 0.5, %v176_v22 }
 0x1df   :  { %v178_v24 = vsub.f32 1.5, %v177_v23 }
 0x1e1   :  { %v179_v25 = vmul.f32 %v222_v20, %v178_v24 }
 0x1e3   :  { %v183_v26 = vsel %vm182_vm4, %v222_v20, %v179_v25 }
 0x1e4   :  { %213 = vpush %v183_v26 }
 0x215   :  { %s214_s5 = spop %213 }
 0x216   :  { %v185_v28 = vstv %s214_s5 }
 0x217   :  { %v186_v29 = vmul.f32 %v185_v28, %v159_v27 }
 0x219   :  { %187 = vst.msk [vmem:[#allocation8] sm:$0xff] %vm64_vm0, %v186_v29 }
 0x21a   :  { %198 = dma.vmem_to_hbm [thread:$0]  %s194_s28, 128, %s196_s4, [#allocation4]  }
 0x21b   :  { %323 = dma.done.wait [#allocation4], 128  }
 0x21c   :  { %324 = vsyncadd [#allocation4], 4294967168 }
 0x21d   :  { %203 = vsyncpa [#allocation3], 1 }
 0x21e   :  { %204 = vsyncpa [#allocation6], 1 }
 0x21f   :  { %205 = vsyncpa [#allocation4], 1 }

</bundles_post_ra>
